<compile_context>
chip_gen: v6e
topology: v6e:2x2x1
jax: 0.10.0
libtpu: 0.0.40
codegen_flags: <defaults>
</compile_context>

<pallas_src>
import functools

import jax
import jax.numpy as jnp
from jax.experimental import pallas as pl
from jax.experimental.pallas import tpu as pltpu


def _round_up(x: int, m: int) -> int:
    return ((x + m - 1) // m) * m


def _mlp_kernel(x_ref, w1_ref, b1_ref, w2_ref, b2_ref, o_ref):
    # First linear layer (MXU matmul, f32 accumulate) + bias, then ReLU (VPU).
    h = jnp.dot(x_ref[...], w1_ref[...], preferred_element_type=jnp.float32)
    h = jnp.maximum(h + b1_ref[...], 0.0)          # b1 is (1, hidden), broadcasts
    # Second linear layer + bias.
    out = jnp.dot(h.astype(w2_ref.dtype), w2_ref[...],
                  preferred_element_type=jnp.float32)
    o_ref[...] = (out + b2_ref[...]).astype(o_ref.dtype)


@functools.partial(jax.jit, static_argnames=("interpret",))
def net_forward(x, w1, b1, w2, b2, *, interpret=False):
    """Forward pass of Net.

    x : (B, size_in)
    w1: (size_in, hidden)   b1: (1, hidden)
    w2: (hidden, size_in)   b2: (1, size_in)
    returns (B, size_in)
    """
    B, size_in = x.shape
    hidden = w1.shape[1]
    dtype = x.dtype
    itemsize = jnp.dtype(dtype).itemsize

    # --- lane-dense padding of the feature dim (input K and output N) -------
    Np = _round_up(size_in, 128)

    # --- batch tile sized against a VMEM budget that is safe on v7x ---------
    # Double-buffered x tile + out tile: 2 * 2 * TB * Np * itemsize bytes.
    # Budget ~24 MiB for the streamed tiles (weights are tiny, resident),
    # well under v7x's 64 MiB physical VMEM and the 48 MiB scoped limit below.
    tile_budget_bytes = 24 * 1024 * 1024
    max_tb = tile_budget_bytes // (4 * Np * itemsize)
    max_tb = max(8, (max_tb // 8) * 8)             # sublane-aligned, >= 8
    TB = min(max_tb, _round_up(B, 8))
    B_pad = _round_up(B, TB)
    grid = (B_pad // TB,)

    # --- pad operands in the wrapper (zero padding is mathematically inert,
    #     padded rows/cols are sliced off after the call) --------------------
    x_p = jnp.pad(x, ((0, B_pad - B), (0, Np - size_in)))
    w1_p = jnp.pad(w1, ((0, Np - size_in), (0, 0)))
    w2_p = jnp.pad(w2, ((0, 0), (0, Np - size_in)))
    b2_p = jnp.pad(b2, ((0, 0), (0, Np - size_in)))

    cost = pl.CostEstimate(
        flops=4 * B_pad * Np * hidden,              # two matmuls
        transcendentals=0,
        bytes_accessed=(2 * B_pad * Np + 2 * Np * hidden + hidden + Np) * itemsize,
    )

    out_p = pl.pallas_call(
        _mlp_kernel,
        out_shape=jax.ShapeDtypeStruct((B_pad, Np), dtype),
        grid=grid,
        in_specs=[
            pl.BlockSpec((TB, Np), lambda i: (i, 0)),        # x: streamed per tile
            pl.BlockSpec((Np, hidden), lambda i: (0, 0)),    # w1: resident
            pl.BlockSpec((1, hidden), lambda i: (0, 0)),     # b1: resident
            pl.BlockSpec((hidden, Np), lambda i: (0, 0)),    # w2: resident
            pl.BlockSpec((1, Np), lambda i: (0, 0)),         # b2: resident
        ],
        out_specs=pl.BlockSpec((TB, Np), lambda i: (i, 0)),
        compiler_params=pltpu.CompilerParams(
            dimension_semantics=("parallel",),               # megacore on v7x
            vmem_limit_bytes=48 * 1024 * 1024,               # < 64 MiB (v7x-safe)
        ),
        cost_estimate=cost,
        interpret=interpret,
    )(x_p, w1_p, b1, w2_p, b2_p)

    return out_p[:B, :size_in]


def init_params(key, size_in, hidden=10, dtype=jnp.float32):
    """Deterministic PyTorch-style (uniform +-1/sqrt(fan_in)) Linear init."""
    k1, k2, k3, k4 = jax.random.split(key, 4)
    bound1 = 1.0 / (size_in ** 0.5)
    bound2 = 1.0 / (hidden ** 0.5)
    # Stored as (in, out) so the kernel does x @ W + b.
    w1 = jax.random.uniform(k1, (size_in, hidden), dtype, -bound1, bound1)
    b1 = jax.random.uniform(k2, (1, hidden), dtype, -bound1, bound1)
    w2 = jax.random.uniform(k3, (hidden, size_in), dtype, -bound2, bound2)
    b2 = jax.random.uniform(k4, (1, size_in), dtype, -bound2, bound2)
    return w1, b1, w2, b2


if __name__ == "__main__":
    key = jax.random.PRNGKey(0)
    kx, kp = jax.random.split(key)

    batch, size_in = 8, 16
    x = jax.random.normal(kx, (batch, size_in), dtype=jnp.float32)
    w1, b1, w2, b2 = init_params(kp, size_in)

    out = net_forward(x, w1, b1, w2, b2)
    out = jax.block_until_ready(out)

    # Pure-JAX reference of the same math.
    ref = jnp.maximum(x @ w1 + b1, 0.0) @ w2 + b2
    assert out.shape == (batch, size_in)
    assert jnp.allclose(out, ref, atol=1e-5, rtol=1e-5)

    print("KERNEL_OK")
</pallas_src>

<mosaic_0001>
module attributes {stable_mosaic.version = 11 : i64} {
  func.func @_mlp_kernel(%arg0: i32, %arg1: memref<8x128xf32, #tpu.memory_space<vmem>>, %arg2: memref<128x10xf32, #tpu.memory_space<vmem>>, %arg3: memref<1x10xf32, #tpu.memory_space<vmem>>, %arg4: memref<10x128xf32, #tpu.memory_space<vmem>>, %arg5: memref<1x128xf32, #tpu.memory_space<vmem>>, %arg6: memref<8x128xf32, #tpu.memory_space<vmem>>) attributes {dimension_semantics = [#tpu.dimension_semantics<parallel>], iteration_bounds = array<i64: 1>, scalar_prefetch = 0 : i64, scratch_operands = 0 : i64, tpu.core_type = #tpu.core_type<tc>, window_params = [{transform_indices = @transform_0, window_bounds = array<i64: 8, 128>}, {pipeline_mode = #tpu.pipeline_mode<synchronous>, transform_indices = @transform_1, window_bounds = array<i64: 128, 10>}, {pipeline_mode = #tpu.pipeline_mode<synchronous>, transform_indices = @transform_2, window_bounds = array<i64: 1, 10>}, {pipeline_mode = #tpu.pipeline_mode<synchronous>, transform_indices = @transform_3, window_bounds = array<i64: 10, 128>}, {pipeline_mode = #tpu.pipeline_mode<synchronous>, transform_indices = @transform_4, window_bounds = array<i64: 1, 128>}, {transform_indices = @transform_5, window_bounds = array<i64: 8, 128>}]} {
    %c0 = arith.constant 0 : index
    %c0_0 = arith.constant 0 : index
    %0 = vector.load %arg1[%c0, %c0_0] : memref<8x128xf32, #tpu.memory_space<vmem>>, vector<8x128xf32>
    %c0_1 = arith.constant 0 : index
    %c0_2 = arith.constant 0 : index
    %1 = vector.load %arg2[%c0_1, %c0_2] : memref<128x10xf32, #tpu.memory_space<vmem>>, vector<128x10xf32>
    %cst = arith.constant dense<0.000000e+00> : vector<8x10xf32>
    %2 = tpu.matmul %0, %1, %cst {dimension_numbers = #tpu.dot_dimension_numbers<[1], [0], [0], [1], [0, 0, 1, 1], [], []>} : vector<8x128xf32>, vector<128x10xf32>, vector<8x10xf32> -> vector<8x10xf32>
    %c0_3 = arith.constant 0 : index
    %c0_4 = arith.constant 0 : index
    %3 = vector.load %arg3[%c0_3, %c0_4] : memref<1x10xf32, #tpu.memory_space<vmem>>, vector<1x10xf32>
    %4 = vector.broadcast %3 : vector<1x10xf32> to vector<8x10xf32>
    %5 = arith.addf %2, %4 : vector<8x10xf32>
    %cst_5 = arith.constant 0.000000e+00 : f32
    %6 = vector.broadcast %cst_5 : f32 to vector<8x10xf32>
    %7 = arith.maximumf %5, %6 : vector<8x10xf32>
    %c0_6 = arith.constant 0 : index
    %c0_7 = arith.constant 0 : index
    %8 = vector.load %arg4[%c0_6, %c0_7] : memref<10x128xf32, #tpu.memory_space<vmem>>, vector<10x128xf32>
    %cst_8 = arith.constant dense<0.000000e+00> : vector<8x128xf32>
    %9 = tpu.matmul %7, %8, %cst_8 {dimension_numbers = #tpu.dot_dimension_numbers<[1], [0], [0], [1], [0, 0, 1, 1], [], []>} : vector<8x10xf32>, vector<10x128xf32>, vector<8x128xf32> -> vector<8x128xf32>
    %c0_9 = arith.constant 0 : index
    %c0_10 = arith.constant 0 : index
    %10 = vector.load %arg5[%c0_9, %c0_10] : memref<1x128xf32, #tpu.memory_space<vmem>>, vector<1x128xf32>
    %11 = vector.broadcast %10 : vector<1x128xf32> to vector<8x128xf32>
    %12 = arith.addf %9, %11 : vector<8x128xf32>
    %c0_11 = arith.constant 0 : index
    %c0_12 = arith.constant 0 : index
    %13 = vector.load %arg6[%c0_11, %c0_12] : memref<8x128xf32, #tpu.memory_space<vmem>>, vector<8x128xf32>
    tpu.vector_store %arg6[%c0_11, %c0_12], %12 {strides = array<i32>} : memref<8x128xf32, #tpu.memory_space<vmem>>, vector<8x128xf32>,
    return
  }
  func.func @transform_0(%arg0: i32) -> (i32, i32) {
    %c0_i32 = arith.constant 0 : i32
    %c0_i32_0 = arith.constant 0 : i32
    return %arg0, %c0_i32 : i32, i32
  }
  func.func @transform_1(%arg0: i32) -> (i32, i32) {
    %c0_i32 = arith.constant 0 : i32
    %c0_i32_0 = arith.constant 0 : i32
    %c0_i32_1 = arith.constant 0 : i32
    return %c0_i32, %c0_i32_0 : i32, i32
  }
  func.func @transform_2(%arg0: i32) -> (i32, i32) {
    %c0_i32 = arith.constant 0 : i32
    %c0_i32_0 = arith.constant 0 : i32
    %c0_i32_1 = arith.constant 0 : i32
    return %c0_i32, %c0_i32_0 : i32, i32
  }
  func.func @transform_3(%arg0: i32) -> (i32, i32) {
    %c0_i32 = arith.constant 0 : i32
    %c0_i32_0 = arith.constant 0 : i32
    %c0_i32_1 = arith.constant 0 : i32
    return %c0_i32, %c0_i32_0 : i32, i32
  }
  func.func @transform_4(%arg0: i32) -> (i32, i32) {
    %c0_i32 = arith.constant 0 : i32
    %c0_i32_0 = arith.constant 0 : i32
    %c0_i32_1 = arith.constant 0 : i32
    return %c0_i32, %c0_i32_0 : i32, i32
  }
  func.func @transform_5(%arg0: i32) -> (i32, i32) {
    %c0_i32 = arith.constant 0 : i32
    %c0_i32_0 = arith.constant 0 : i32
    return %arg0, %c0_i32 : i32, i32
  }
}

</mosaic_0001>

<bundles_post_ra>
// kernel: net_forward.1
= control target key start
LH: loop header
LB: loop body
LE: loop exit
PB: predicated region body
PF: predicated region fallthrough
CT: control target
= control target key end

     0   :  { %v309_v1 = vmov 0.0   ;;  %vm310_vm0 = vmmov 0   ;;  %s408_s0 = inlined_call_operand.vmem [shape: f32[8,128], index: 0, kind: input, shape index: {}]   ;;  %s409_s1 = inlined_call_operand.vmem [shape: f32[128,10], index: 1, kind: input, shape index: {}]   ;;  %s410_s2 = inlined_call_operand.vmem [shape: f32[1,10], index: 2, kind: input, shape index: {}]   ;;  %s411_s3 = inlined_call_operand.vmem [shape: f32[10,128], index: 3, kind: input, shape index: {}]   ;;  %s412_s4 = inlined_call_operand.vmem [shape: f32[1,128], index: 4, kind: input, shape index: {}]   ;;  %s413_s5 = inlined_call_operand.hbm [shape: f32[8,128], index: 5, kind: output, shape index: {}]  }
   0x1   :  { %v37_v0 = vld [vmem:[%s409_s1 + $0x78] sm:$0xff]  ;;  %242 = vmatprep.subr.mxu0 %v309_v1  ;;  %v36_v2 = vld [vmem:[%s409_s1 + $0x70] sm:$0xff]  ;;  %274 = vmatprep.mubr.msk.f32.mxu0 %vm310_vm0, %v309_v1  ;;  %v35_v3 = vld [vmem:[%s409_s1 + $0x68] sm:$0xff] }
   0x2   :  { %243 = vmatpush3.msra.mxu0 %v37_v0  ;;  %277 = vmatprep.subr.mxu1 %v309_v1  ;;  %v34_v4 = vld [vmem:[%s409_s1 + $0x60] sm:$0xff] }
   0x3   :  { %244 = vmatprep.subr.mxu0 %v309_v1  ;;  %281 = vmatprep.mubr.msk.f32.mxu1 %vm310_vm0, %v309_v1 }
   0x4   :  { %245 = vmatpush3.msra.mxu0 %v36_v2 }
   0x5   :  { %246 = vmatprep.subr.mxu0 %v309_v1 }
   0x6   :  { %247 = vmatpush3.msra.mxu0 %v35_v3 }
   0x7   :  { %10 = vsyncpa [#allocation3], 0  ;;  %248 = vmatprep.subr.mxu0 %v309_v1  ;;  %v33_v5 = vld [vmem:[%s409_s1 + $0x58] sm:$0xff]  ;;  %v32_v6 = vld [vmem:[%s409_s1 + $0x50] sm:$0xff]  ;;  %vm129_vm1 = vcmask 1041408   ;;  %vm125_vm2 = vcmask 80896  }
   0x8   :  { %249 = vmatpush3.msra.mxu0 %v34_v4  ;;  %v31_v7 = vld [vmem:[%s409_s1 + $0x48] sm:$0xff]  ;;  %v30_v8 = vld [vmem:[%s409_s1 + $0x40] sm:$0xff]  ;;  %v29_v9 = vld [vmem:[%s409_s1 + $0x38] sm:$0xff]  ;;  %s311_s8 = smov [#allocation2]  }
   0x9   :  { %250 = vmatprep.subr.mxu0 %v309_v1  ;;  %v28_v10 = vld [vmem:[%s409_s1 + $0x30] sm:$0xff]  ;;  %v27_v11 = vld [vmem:[%s409_s1 + $0x28] sm:$0xff]  ;;  %v26_v12 = vld [vmem:[%s409_s1 + $0x20] sm:$0xff]  ;;  %s210_s9 = sshll.u32 %s311_s8, 4  ;;  %s211_s9 = int_to_ptr.vmem [resolvable:$true] %s210_s9 }
   0xa   :  { %251 = vmatpush3.msra.mxu0 %v33_v5  ;;  %v25_v13 = vld [vmem:[%s409_s1 + $0x18] sm:$0xff]  ;;  %v24_v14 = vld [vmem:[%s409_s1 + $0x10] sm:$0xff]  ;;  %v23_v15 = vld [vmem:[%s409_s1 + $0x8] sm:$0xff]  ;;  %p292_p1 = scmp.lt.s32.totalorder %s211_s9, %s211_s9 }
   0xb   :  { %252 = vmatprep.subr.mxu0 %v309_v1  ;;  %v22_v16 = vld [vmem:[%s409_s1] sm:$0xff]  ;;  %v117_v18 = vld [vmem:[%s411_s3 + $0x8] sm:$0x3] }
   0xc   :  { %253 = vmatpush3.msra.mxu0 %v32_v6  ;;  %v21_v17 = vld [vmem:[%s408_s0] sm:$0xff]  ;;  %278 = vmatpush3.msk.msra.mxu1 %vm129_vm1, %v117_v18 }
   0xd   :  { %254 = vmatprep.subr.mxu0 %v309_v1  ;;  %279 = vmatprep.subr.mxu1 %v309_v1  ;;  %v116_v19 = vld [vmem:[%s411_s3] sm:$0xff]  ;;  %s287_s3 = scalar_lea.vmem %s211_s9, 128 }
   0xe   :  { %255 = vmatpush3.msra.mxu0 %v31_v7  ;;  %280 = vmatpush3.msra.mxu1 %v116_v19  ;;  %v218_v20 = vld [vmem:[%s410_s2] ss:$0 sm:$0xff]  ;;  %p288_p0 = scmp.ne.s32.totalorder %s211_s9, %s287_s3  ;;  %p293_p2 = scmp.lt.s32.totalorder %s287_s3, %s287_s3 }
   0xf   :  { %256 = vmatprep.subr.mxu0 %v309_v1  ;;  %v219_v25 = vld [vmem:[%s412_s4] ss:$0 sm:$0xff] }
  0x10   :  { %257 = vmatpush3.msra.mxu0 %v30_v8  ;;  %p294_p3 = por %p293_p2, %p292_p1 }
  0x11   :  { %258 = vmatprep.subr.mxu0 %v309_v1 }
  0x12   :  { %259 = vmatpush3.msra.mxu0 %v29_v9  ;;  %p295_p4 = pnand %p294_p3, %p288_p0 }
  0x13   :  { %260 = vmatprep.subr.mxu0 %v309_v1 }
  0x14   :  { %261 = vmatpush3.msra.mxu0 %v28_v10 }
  0x15   :  { %262 = vmatprep.subr.mxu0 %v309_v1 }
  0x16   :  { %263 = vmatpush3.msra.mxu0 %v27_v11 }
  0x17   :  { %264 = vmatprep.subr.mxu0 %v309_v1 }
  0x18   :  { %265 = vmatpush3.msra.mxu0 %v26_v12 }
  0x19   :  { %266 = vmatprep.subr.mxu0 %v309_v1 }
  0x1a   :  { %267 = vmatpush3.msra.mxu0 %v25_v13 }
  0x1b   :  { %268 = vmatprep.subr.mxu0 %v309_v1 }
  0x1c   :  { %269 = vmatpush3.msra.mxu0 %v24_v14 }
  0x1d   :  { %270 = vmatprep.subr.mxu0 %v309_v1 }
  0x1e   :  { %271 = vmatpush3.msra.mxu0 %v23_v15 }
  0x1f   :  { %272 = vmatprep.subr.mxu0 %v309_v1 }
  0x20   :  { %273 = vmatpush3.msra.mxu0 %v22_v16 }
  0x21   :  { %275 = vmatmul.mubr.f32.vlgmr.msra.gmra.mxu0 %v21_v17 }
  0xe1   :  { %v111_v21 = vpop.f32.mrf.mxu0 }
  0xe2   :  { %v112_v22 = vadd.f32 %v218_v20, %v111_v21 }
  0xe3   :  { %v276_v23 = vpop.f32.mrf.mxu0 }
  0xe4   :  { %v115_v24 = vmax.f32 %v112_v22, 0.0 }
  0xe6   :  { %282 = vmatmul.mubr.msk.f32.vlgmr.msra.gmra.mxu1 %vm125_vm2, %v115_v24 }
 0x1a6   :  { %v199_v26 = vpop.f32.mrf.mxu1 }
 0x1a7   :  { %v200_v27 = vadd.f32 %v219_v25, %v199_v26 }
 0x1a8   :  { %v283_v28 = vpop.f32.mrf.mxu1 }
 0x1a9   :  { %203 = vst [vmem:[#allocation2] sm:$0xff] %v200_v27 }
 0x1aa   :  { %298 = shalt.err (!%p295_p4)
}
 0x1ab   :  { %213 = dma.vmem_to_hbm [thread:$0]  %s211_s9, 128, %s413_s5, [#allocation3]  }
 0x1ac   :  { %307 = dma.done.wait [#allocation3], 128  }
 0x1ad   :  { %308 = vsyncadd [#allocation3], 4294967168 }
 0x1ae   :  { %217 = vsyncpa [#allocation3], 1 }

</bundles_post_ra>
